<compile_context>
chip_gen: v7x
topology: tpu7x:2x2x1
jax: 0.10.0
libtpu: 0.0.40
codegen_flags: <defaults>
</compile_context>

<pallas_src>
import jax
import jax.numpy as jnp
from jax.experimental import pallas as pl
from jax.experimental.pallas import tpu as pltpu


NEG_BIAS = -1e30  # additive logit bias for non-edges (finite on purpose: the
                  # online softmax stays NaN-free on all-masked partial tiles
                  # and bogus contributions are rescaled to 0 by exp(m_old-m_new))


def _round_up(x, m):
    return ((x + m - 1) // m) * m


def _vmem_capacity_bytes():
    """Physical VMEM of the attached TPU (v5e/v6e: 128 MiB, v7x: 64 MiB/core)."""
    try:
        info = pltpu.get_tpu_info()
        cap = int(getattr(info, "vmem_capacity_bytes", 0) or 0)
        if cap > 0:
            return cap
    except Exception:
        pass
    return 64 * 1024 * 1024  # conservative default = v7x per-core capacity


# ----------------------------------------------------------------------------
# Kernel 1: lin_l projection (row-tiled, lane-dense [N, F] output)
# ----------------------------------------------------------------------------
def _lin_l_kernel(x_ref, w_ref, b_ref, o_ref):
    o_ref[...] = (
        jnp.dot(x_ref[...], w_ref[...], preferred_element_type=jnp.float32)
        + b_ref[...]
    )


def _lin_l_footprint(tm, f_in, f_out):
    f_in_p, f_out_p = _round_up(f_in, 128), _round_up(f_out, 128)
    tm_p = _round_up(tm, 8)
    stream = 2 * tm_p * f_in_p * 4 + 2 * tm_p * f_out_p * 4   # in + out, x2 buffers
    consts = 2 * (f_in_p * f_out_p * 4 + f_out_p * 4)         # W^T, bias (charged x2)
    return stream + consts


def _pick_row_tile(n, f_in, f_out, budget):
    if n % 8 != 0:
        return n
    best = 8
    for tm in range(8, min(n, 1024) + 1, 8):
        if n % tm == 0 and _lin_l_footprint(tm, f_in, f_out) <= budget:
            best = tm
    return best


def lin_l_project(x, wlt, bl_row, *, vmem_cap):
    """x_l = x @ Wl^T + bl."""
    n, f_in = x.shape
    f_out = wlt.shape[1]
    tm = _pick_row_tile(n, f_in, f_out, int(vmem_cap * 0.8))
    limit = int(min(int(vmem_cap * 0.9),
                    max(_lin_l_footprint(tm, f_in, f_out) + (4 << 20), 32 << 20)))
    return pl.pallas_call(
        _lin_l_kernel,
        out_shape=jax.ShapeDtypeStruct((n, f_out), jnp.float32),
        grid=(n // tm,),
        in_specs=[
            pl.BlockSpec((tm, f_in), lambda i: (i, 0)),
            pl.BlockSpec((f_in, f_out), lambda i: (0, 0)),
            pl.BlockSpec((1, f_out), lambda i: (0, 0)),
        ],
        out_specs=pl.BlockSpec((tm, f_out), lambda i: (i, 0)),
        compiler_params=pltpu.CompilerParams(
            dimension_semantics=("parallel",),
            vmem_limit_bytes=limit,
        ),
    )(x, wlt, bl_row)


# ----------------------------------------------------------------------------
# Kernel 2: fused GATv2 attention (lin_r + lin_edge + online softmax +
#           aggregation + bias + SiLU + residual), grid = (target, source)
# ----------------------------------------------------------------------------
def _gat_res_kernel(xl_ref, x_ref, ed_ref, ab_ref, wrt_ref, br_ref, wet_ref,
                    attm_ref, bias_ref, o_ref, xr_sc, m_sc, l_sc, acc_sc):
    k = pl.program_id(1)
    ti, tk, e_dim = ed_ref.shape
    f = xl_ref.shape[-1]
    heads = attm_ref.shape[-1]
    d = f // heads

    # ---- per-target-tile init (first source tile) --------------------------
    @pl.when(k == 0)
    def _init():
        # fused lin_r: x_r for this target tile, computed once, kept in VMEM
        xr_sc[...] = (
            jnp.dot(x_ref[...], wrt_ref[...], preferred_element_type=jnp.float32)
            + br_ref[...]
        )
        m_sc[...] = jnp.full(m_sc.shape, -jnp.inf, m_sc.dtype)
        l_sc[...] = jnp.zeros(l_sc.shape, l_sc.dtype)
        acc_sc[...] = jnp.zeros(acc_sc.shape, acc_sc.dtype)

    xl = xl_ref[...]                                       # [tk, F] lin_l (sources)
    xr = xr_sc[...]                                        # [ti, F] lin_r (targets)

    # ---- fused lin_edge: bf16 MXU matmul, f32 accumulation -----------------
    e = jnp.dot(ed_ref[...].reshape(ti * tk, e_dim), wet_ref[...],
                preferred_element_type=jnp.float32)        # [ti*tk, F]

    # s[t, j, :] = x_r[t] + x_l[j] + e[t, j]; leaky_relu(slope = 0.2)
    s = (xr[:, None, :] + xl[None, :, :]).reshape(ti * tk, f) + e
    s = jnp.maximum(s, 0.2 * s)

    # ---- all-heads logits in one MXU matmul ---------------------------------
    logits = jnp.dot(s, attm_ref[...], preferred_element_type=jnp.float32)
    logits = logits.reshape(ti, tk, heads)
    # additive adjacency bias (0 = edge / self loop, -1e30 = no edge),
    # hoisted out of any per-head work
    logits = logits + ab_ref[...].astype(jnp.float32)[:, :, None]

    # ---- online softmax over the source (reduction) axis -------------------
    m_prev = m_sc[...]                                     # [ti, H]
    m_new = jnp.maximum(m_prev, jnp.max(logits, axis=1))   # [ti, H]
    corr = jnp.exp(m_prev - m_new)                         # [ti, H]
    p = jnp.exp(logits - m_new[:, None, :])                # [ti, tk, H]
    l_sc[...] = corr * l_sc[...] + jnp.sum(p, axis=1)
    m_sc[...] = m_new

    # ---- weighted message aggregation (per-head MXU matmuls) ---------------
    pv_cols, corr_cols = [], []
    for h in range(heads):                                 # heads is small: unrolled
        sl = slice(h * d, (h + 1) * d)
        pv_cols.append(jnp.dot(p[:, :, h], xl[:, sl],
                               preferred_element_type=jnp.float32))      # [ti, D]
        corr_cols.append(jnp.broadcast_to(corr[:, h:h + 1], (ti, d)))
    acc_sc[...] = (jnp.concatenate(corr_cols, axis=-1) * acc_sc[...]
                   + jnp.concatenate(pv_cols, axis=-1))    # [ti, F] lane-dense store

    # ---- epilogue: normalize, + bias_gat, SiLU, residual (last source tile) -
    @pl.when(k == pl.num_programs(1) - 1)
    def _fin():
        inv_l = pl.reciprocal(l_sc[...])                   # exact softmax norm
        inv_cols = [jnp.broadcast_to(inv_l[:, h:h + 1], (ti, d))
                    for h in range(heads)]
        hgat = acc_sc[...] * jnp.concatenate(inv_cols, axis=-1) + bias_ref[...]
        sig = pl.reciprocal(1.0 + jnp.exp(-hgat), approx=True)  # SiLU via EUP
        o_ref[...] = x_ref[...] + hgat * sig


def _attention_footprint(ti, tk, f, e_dim, heads):
    """Padded VMEM bytes for one grid step of the fused attention kernel:
    double-buffered streams + resident weights (charged x2) + scratch +
    in-kernel f32 temporaries (e/s ~ [ti*tk, F], logits/p lane-padded)."""
    lane = 128
    f_p = _round_up(f, lane)
    ti8, tk8 = _round_up(ti, 8), _round_up(tk, 8)
    ti16, tk16 = _round_up(ti, 16), _round_up(tk, 16)
    stream = 2 * (
        tk8 * f_p * 4                                # x_l source tile (f32)
        + ti8 * f_p * 4                              # x target / residual tile (f32)
        + ti * tk16 * _round_up(e_dim, lane) * 2     # edge-attr tile (bf16, padded)
        + ti16 * _round_up(tk, lane) * 2             # adjacency bias tile (bf16)
    )
    out = 2 * ti8 * f_p * 4
    consts = 2 * (
        f_p * f_p * 4 + f_p * 4                      # Wr^T, br
        + _round_up(e_dim, 16) * f_p * 2             # We^T (bf16)
        + f_p * lane * 4                             # att matrix A (heads lane-padded)
        + f_p * 4                                    # GAT bias
    )
    scratch = 2 * ti8 * f_p * 4 + 2 * ti8 * lane * 4
    temps = 3 * ti * tk8 * f_p * 4 + 2 * ti * tk8 * lane * 4
    return stream + out + consts + scratch + temps


def _tile_candidates(n, cap):
    if n < 8 or n % 8 != 0:
        return [n]
    return sorted((t for t in range(8, min(n, cap) + 1, 8) if n % t == 0),
                  reverse=True)


def _pick_attention_tiles(n, f, e_dim, heads, budget):
    """Largest (ti, tk) whose padded footprint fits `budget`; maximizes tile
    area (fewest grid steps), prefers square-ish tiles and big target tiles."""
    best_key, best = None, None
    for ti in _tile_candidates(n, 256):
        for tk in _tile_candidates(n, 512):
            if _attention_footprint(ti, tk, f, e_dim, heads) <= budget:
                key = (ti * tk, min(ti, tk), ti)
                if best_key is None or key > best_key:
                    best_key, best = key, (ti, tk)
    if best is None:
        t = 8 if (n % 8 == 0 and n >= 8) else n
        best = (t, t)
    return best


def gat_attention_residual(x_l, x, ed, adj_bias, wrt, br_row, wet, attm,
                           bias_row, *, heads, ti, tk, vmem_limit):
    n, f = x.shape
    e_dim = ed.shape[-1]
    assert n % ti == 0 and n % tk == 0
    return pl.pallas_call(
        _gat_res_kernel,
        out_shape=jax.ShapeDtypeStruct((n, f), jnp.float32),
        grid=(n // ti, n // tk),                    # (target tiles, source tiles)
        in_specs=[
            pl.BlockSpec((tk, f), lambda i, k: (k, 0)),             # x_l (streamed)
            pl.BlockSpec((ti, f), lambda i, k: (i, 0)),             # x (resident over k)
            pl.BlockSpec((ti, tk, e_dim), lambda i, k: (i, k, 0)),  # edge attrs (bf16)
            pl.BlockSpec((ti, tk), lambda i, k: (i, k)),            # adjacency bias (bf16)
            pl.BlockSpec((f, f), lambda i, k: (0, 0)),              # Wr^T
            pl.BlockSpec((1, f), lambda i, k: (0, 0)),              # br
            pl.BlockSpec((e_dim, f), lambda i, k: (0, 0)),          # We^T (bf16)
            pl.BlockSpec((f, heads), lambda i, k: (0, 0)),          # att matrix A
            pl.BlockSpec((1, f), lambda i, k: (0, 0)),              # GAT output bias
        ],
        out_specs=pl.BlockSpec((ti, f), lambda i, k: (i, 0)),
        scratch_shapes=[
            pltpu.VMEM((ti, f), jnp.float32),       # x_r (fused lin_r)
            pltpu.VMEM((ti, heads), jnp.float32),   # online-softmax running max
            pltpu.VMEM((ti, heads), jnp.float32),   # online-softmax running sum
            pltpu.VMEM((ti, f), jnp.float32),       # weighted-message accumulator
        ],
        compiler_params=pltpu.CompilerParams(
            dimension_semantics=("parallel", "arbitrary"),
            vmem_limit_bytes=int(vmem_limit),
        ),
    )(x_l, x, ed, adj_bias, wrt, br_row, wet, attm, bias_row)


# ----------------------------------------------------------------------------
# Host-side glue
# ----------------------------------------------------------------------------
def build_dense_graph(edge_index, edge_attr, num_nodes):
    """Dense bf16 edge attrs + additive bf16 adjacency bias; self loops filled
    with the per-target mean of incoming edge attrs (PyG fill_value='mean';
    isolated nodes get 0, matching scatter_mean on an empty set)."""
    src, dst = edge_index[0], edge_index[1]
    e_dim = edge_attr.shape[1]
    adj = jnp.zeros((num_nodes, num_nodes), jnp.bool_).at[dst, src].set(True)
    ed = jnp.zeros((num_nodes, num_nodes, e_dim), jnp.float32).at[dst, src].set(edge_attr)
    sums = jnp.zeros((num_nodes, e_dim), jnp.float32).at[dst].add(edge_attr)
    cnt = jnp.zeros((num_nodes,), jnp.float32).at[dst].add(1.0)
    mean_attr = sums / jnp.maximum(cnt, 1.0)[:, None]
    idx = jnp.arange(num_nodes)
    adj = adj.at[idx, idx].set(True)
    ed = ed.at[idx, idx].set(mean_attr)
    adj_bias = jnp.where(adj, 0.0, NEG_BIAS).astype(jnp.bfloat16)
    return ed.astype(jnp.bfloat16), adj_bias


def prepare_params(params, *, heads, dims):
    """One-time parameter prep (no per-forward transposes / concats)."""
    f = heads * dims
    att = params["att"]                                   # [H, D]
    eye = jnp.eye(heads, dtype=att.dtype)
    attm = (att[:, :, None] * eye[:, None, :]).reshape(f, heads)   # A[h*d+dd, h]
    return {
        "wlt": params["Wl"].T,                            # [F, F]
        "bl": params["bl"].reshape(1, f),
        "wrt": params["Wr"].T,                            # [F, F]
        "br": params["br"].reshape(1, f),
        "wet": params["We"].T.astype(jnp.bfloat16),       # [E, F] bf16
        "attm": attm,                                     # [F, H]
        "bias": params["bias"].reshape(1, f),
    }


def res_layer_forward(x, edge_index, edge_attr, prepped, *, heads, dims,
                      ti=None, tk=None):
    n, f = x.shape
    e_dim = prepped["wet"].shape[0]
    cap = _vmem_capacity_bytes()

    x_l = lin_l_project(x, prepped["wlt"], prepped["bl"], vmem_cap=cap)
    ed, adj_bias = build_dense_graph(edge_index, edge_attr, n)

    if ti is None or tk is None:
        auto_ti, auto_tk = _pick_attention_tiles(n, f, e_dim, heads, int(cap * 0.8))
        ti = ti or auto_ti
        tk = tk or auto_tk
    fp = _attention_footprint(ti, tk, f, e_dim, heads)
    vmem_limit = min(int(cap * 0.9), max(fp + (8 << 20), 32 << 20))

    return gat_attention_residual(
        x_l, x, ed, adj_bias, prepped["wrt"], prepped["br"], prepped["wet"],
        prepped["attm"], prepped["bias"],
        heads=heads, ti=ti, tk=tk, vmem_limit=vmem_limit)


# ----------------------------------------------------------------------------
# Pure-JAX reference (dense, f32) for correctness checking
# ----------------------------------------------------------------------------
def res_layer_reference(x, edge_index, edge_attr, params, *, heads, dims):
    n, f = x.shape
    e_dim = edge_attr.shape[1]
    src, dst = edge_index[0], edge_index[1]
    sums = jnp.zeros((n, e_dim)).at[dst].add(edge_attr)
    cnt = jnp.zeros((n,)).at[dst].add(1.0)
    mean_attr = sums / jnp.maximum(cnt, 1.0)[:, None]
    idx = jnp.arange(n)
    adj = jnp.zeros((n, n), bool).at[dst, src].set(True).at[idx, idx].set(True)
    ed = jnp.zeros((n, n, e_dim)).at[dst, src].set(edge_attr).at[idx, idx].set(mean_attr)

    x_l = x @ params["Wl"].T + params["bl"]
    x_r = x @ params["Wr"].T + params["br"]
    e = ed @ params["We"].T                                       # [n, n, F]
    s = x_r[:, None, :] + x_l[None, :, :] + e
    s = jnp.where(s > 0, s, 0.2 * s)
    logits = jnp.einsum("ijhd,hd->ijh", s.reshape(n, n, heads, dims), params["att"])
    logits = jnp.where(adj[:, :, None], logits, -jnp.inf)
    alpha = jax.nn.softmax(logits, axis=1)
    out_h = jnp.einsum("ijh,jhd->ihd", alpha, x_l.reshape(n, heads, dims))
    h = out_h.reshape(n, f) + params["bias"]
    return x + h * jax.nn.sigmoid(h)


# ----------------------------------------------------------------------------
# Deterministic setup + run
# ----------------------------------------------------------------------------
def init_params(key, dims, heads, edge_dim):
    f = dims * heads
    ks = jax.random.split(key, 4)
    glorot = lambda k, shape: jax.random.uniform(
        k, shape, jnp.float32,
        -jnp.sqrt(6.0 / (shape[0] + shape[1])),
        jnp.sqrt(6.0 / (shape[0] + shape[1])),
    )
    return {
        "Wl": glorot(ks[0], (f, f)),           # lin_l weight [out, in]
        "bl": jnp.zeros((f,), jnp.float32),
        "Wr": glorot(ks[1], (f, f)),           # lin_r weight
        "br": jnp.zeros((f,), jnp.float32),
        "We": glorot(ks[2], (f, edge_dim)),    # lin_edge weight (no bias)
        "att": glorot(ks[3], (heads, dims)),   # attention vector per head
        "bias": jnp.zeros((f,), jnp.float32),  # final GAT bias
    }


if __name__ == "__main__":
    dims, heads, edge_dim = 8, 4, 8
    num_nodes, num_edges = 16, 48
    F = dims * heads

    key = jax.random.PRNGKey(0)
    k_x, k_e, k_p = jax.random.split(key, 3)

    x = jax.random.normal(k_x, (num_nodes, F), jnp.float32)
    edge_attr = jax.random.normal(k_e, (num_edges, edge_dim), jnp.float32)
    # deterministic topology: unique (src, dst) pairs, no self loops
    eidx = jnp.arange(num_edges)
    src = eidx % num_nodes
    dst = (src + 1 + eidx // num_nodes) % num_nodes
    edge_index = jnp.stack([src, dst], axis=0).astype(jnp.int32)

    params = init_params(k_p, dims, heads, edge_dim)
    prepped = prepare_params(params, heads=heads, dims=dims)

    # ti = tk = 8 -> 2x2 grid: exercises the "parallel" target axis and the
    # online-softmax "arbitrary" source (reduction) axis.
    out = res_layer_forward(x, edge_index, edge_attr, prepped,
                            heads=heads, dims=dims, ti=8, tk=8)
    out = jax.block_until_ready(out)
    assert out.shape == (num_nodes, F)
    assert bool(jnp.all(jnp.isfinite(out)))

    ref = res_layer_reference(x, edge_index, edge_attr, params,
                              heads=heads, dims=dims)
    err = float(jnp.max(jnp.abs(out - ref)))
    assert err < 5e-2, f"max |out - ref| = {err}"
    print("KERNEL_OK")
</pallas_src>

<mosaic_0001>
module attributes {stable_mosaic.version = 11 : i64} {
  func.func @_lin_l_kernel(%arg0: i32, %arg1: memref<16x32xf32, #tpu.memory_space<vmem>>, %arg2: memref<32x32xf32, #tpu.memory_space<vmem>>, %arg3: memref<1x32xf32, #tpu.memory_space<vmem>>, %arg4: memref<16x32xf32, #tpu.memory_space<vmem>>) attributes {dimension_semantics = [#tpu.dimension_semantics<parallel>], iteration_bounds = array<i64: 1>, scalar_prefetch = 0 : i64, scratch_operands = 0 : i64, tpu.core_type = #tpu.core_type<tc>, window_params = [{transform_indices = @transform_0, window_bounds = array<i64: 16, 32>}, {pipeline_mode = #tpu.pipeline_mode<synchronous>, transform_indices = @transform_1, window_bounds = array<i64: 32, 32>}, {pipeline_mode = #tpu.pipeline_mode<synchronous>, transform_indices = @transform_2, window_bounds = array<i64: 1, 32>}, {transform_indices = @transform_3, window_bounds = array<i64: 16, 32>}]} {
    %c0 = arith.constant 0 : index
    %c0_0 = arith.constant 0 : index
    %0 = vector.load %arg1[%c0, %c0_0] : memref<16x32xf32, #tpu.memory_space<vmem>>, vector<16x32xf32>
    %c0_1 = arith.constant 0 : index
    %c0_2 = arith.constant 0 : index
    %1 = vector.load %arg2[%c0_1, %c0_2] : memref<32x32xf32, #tpu.memory_space<vmem>>, vector<32x32xf32>
    %cst = arith.constant dense<0.000000e+00> : vector<16x32xf32>
    %2 = tpu.matmul %0, %1, %cst {dimension_numbers = #tpu.dot_dimension_numbers<[1], [0], [0], [1], [0, 0, 1, 1], [], []>} : vector<16x32xf32>, vector<32x32xf32>, vector<16x32xf32> -> vector<16x32xf32>
    %c0_3 = arith.constant 0 : index
    %c0_4 = arith.constant 0 : index
    %3 = vector.load %arg3[%c0_3, %c0_4] : memref<1x32xf32, #tpu.memory_space<vmem>>, vector<1x32xf32>
    %4 = vector.broadcast %3 : vector<1x32xf32> to vector<16x32xf32>
    %5 = arith.addf %2, %4 : vector<16x32xf32>
    %c0_5 = arith.constant 0 : index
    %c0_6 = arith.constant 0 : index
    %6 = vector.load %arg4[%c0_5, %c0_6] : memref<16x32xf32, #tpu.memory_space<vmem>>, vector<16x32xf32>
    tpu.vector_store %arg4[%c0_5, %c0_6], %5 {strides = array<i32>} : memref<16x32xf32, #tpu.memory_space<vmem>>, vector<16x32xf32>,
    return
  }
  func.func @transform_0(%arg0: i32) -> (i32, i32) {
    %c0_i32 = arith.constant 0 : i32
    %c0_i32_0 = arith.constant 0 : i32
    return %arg0, %c0_i32 : i32, i32
  }
  func.func @transform_1(%arg0: i32) -> (i32, i32) {
    %c0_i32 = arith.constant 0 : i32
    %c0_i32_0 = arith.constant 0 : i32
    %c0_i32_1 = arith.constant 0 : i32
    return %c0_i32, %c0_i32_0 : i32, i32
  }
  func.func @transform_2(%arg0: i32) -> (i32, i32) {
    %c0_i32 = arith.constant 0 : i32
    %c0_i32_0 = arith.constant 0 : i32
    %c0_i32_1 = arith.constant 0 : i32
    return %c0_i32, %c0_i32_0 : i32, i32
  }
  func.func @transform_3(%arg0: i32) -> (i32, i32) {
    %c0_i32 = arith.constant 0 : i32
    %c0_i32_0 = arith.constant 0 : i32
    return %arg0, %c0_i32 : i32, i32
  }
}

</mosaic_0001>

<bundles_post_ra>
// kernel: tpu_custom_call.1
= control target key start
LH: loop header
LB: loop body
LE: loop exit
PB: predicated region body
PF: predicated region fallthrough
CT: control target
= control target key end

     0   :  { %8 = vsyncpa [#allocation3], 0  ;;  %s340_s0 = inlined_call_operand.hbm [shape: f32[16,32], index: 0, kind: input, shape index: {}]   ;;  %s341_s1 = inlined_call_operand.hbm [shape: f32[32,32], index: 1, kind: input, shape index: {}]   ;;  %s342_s2 = inlined_call_operand.vmem [shape: f32[1,32], index: 2, kind: input, shape index: {}]   ;;  %s343_s3 = inlined_call_operand.hbm [shape: f32[16,32], index: 3, kind: output, shape index: {}]  }
   0x1   :  { %9 = vsyncpa [#allocation6], 0 }
   0x2   :  { %10 = vsyncpa [#allocation4], 0  ;;  %s263_s12 = smov [#allocation2]   ;;  %s191_s16 = scalar_lea.hbm %s340_s0, 256 }
   0x3   :  { %s16_s13 = sshll.u32 %s263_s12, 4  ;;  %p192_p0 = scmp.ne.s32.totalorder %s340_s0, %s191_s16  ;;  %s17_s13 = int_to_ptr.vmem [resolvable:$true] %s16_s13 }
   0x4   :  { %p195_p1 = scmp.lt.u32.totalorder %s191_s16, %s340_s0 }
   0x6   :  { %p197_p2 = pnand %p195_p1, %p192_p0 }
   0x8   :  { %200 = shalt.err (!%p197_p2)
}
   0x9   :  { %s201_s21 = scalar_lea.vmem %s17_s13, 256  ;;  %p206_p4 = scmp.lt.s32.totalorder %s17_s13, %s17_s13 }
   0xa   :  { %p202_p3 = scmp.ne.s32.totalorder %s17_s13, %s201_s21  ;;  %p207_p5 = scmp.lt.s32.totalorder %s201_s21, %s201_s21 }
   0xc   :  { %p208_p6 = por %p207_p5, %p206_p4 }
   0xe   :  { %p209_p7 = pnand %p208_p6, %p202_p3 }
  0x10   :  { %212 = shalt.err (!%p209_p7)
}
  0x11   :  { %s264_s22 = smov 128   ;;  %s265_s23 = smov 8  }
  0x12   :  { %22 = dma.hbm_to_vmem [thread:$0]  %s340_s0, 256, %s17_s13, [#allocation3], %s264_s22, %s264_s22, %s265_s23  }
  0x13   :  { %s266_s26 = smov [#allocation5]   ;;  %s213_s30 = scalar_lea.hbm %s341_s1, 512 }
  0x14   :  { %s28_s27 = sshll.u32 %s266_s26, 4  ;;  %p214_p8 = scmp.ne.s32.totalorder %s341_s1, %s213_s30  ;;  %s29_s27 = int_to_ptr.vmem [resolvable:$true] %s28_s27 }
  0x15   :  { %p217_p9 = scmp.lt.u32.totalorder %s213_s30, %s341_s1 }
  0x17   :  { %p219_p10 = pnand %p217_p9, %p214_p8 }
  0x19   :  { %222 = shalt.err (!%p219_p10)
}
  0x1a   :  { %s223_s8 = scalar_lea.vmem %s29_s27, 512  ;;  %p228_p12 = scmp.lt.s32.totalorder %s29_s27, %s29_s27 }
  0x1b   :  { %p224_p11 = scmp.ne.s32.totalorder %s29_s27, %s223_s8  ;;  %p229_p13 = scmp.lt.s32.totalorder %s223_s8, %s223_s8 }
  0x1d   :  { %p230_p0 = por %p229_p13, %p228_p12 }
  0x1f   :  { %p231_p1 = pnand %p230_p0, %p224_p11 }
  0x21   :  { %234 = shalt.err (!%p231_p1)
}
  0x22   :  { %34 = dma.hbm_to_vmem [thread:$0]  %s341_s1, 512, %s29_s27, [#allocation6], %s264_s22, %s264_s22, %s265_s23  }
  0x23   :  { %257 = dma.done.wait [#allocation3], 256  }
  0x24   :  { %258 = vsyncadd [#allocation3], 4294967040 }
  0x25   :  { %259 = dma.done.wait [#allocation6], 512  }
  0x26   :  { %260 = vsyncadd [#allocation6], 4294966784  ;;  %vm56_vm0 = vcmask 261120   ;;  %v45_v0 = vld [vmem:[#allocation5] sm:$0xff]  ;;  %v46_v1 = vld [vmem:[#allocation5 + $0x8] sm:$0xff]  ;;  %s267_s11 = smov [#allocation7]  }
  0x27   :  { %v47_v2 = vld [vmem:[#allocation5 + $0x10] sm:$0xff]  ;;  %v178_v3 = vpack.c.bf16 %v46_v1, %v45_v0  ;;  %v48_v4 = vld [vmem:[#allocation5 + $0x18] sm:$0xff]  ;;  %s145_s12 = sshll.u32 %s267_s11, 4  ;;  %s146_s12 = int_to_ptr.vmem [resolvable:$true] %s145_s12 }
  0x28   :  { %v43_v5 = vld [vmem:[#allocation2] sm:$0xff]  ;;  %v182_v6 = vpack.c.bf16 %v48_v4, %v47_v2  ;;  %v44_v7 = vld [vmem:[#allocation2 + $0x8] sm:$0xff]  ;;  %s235_s13 = scalar_lea.vmem %s146_s12, 256  ;;  %p240_p3 = scmp.lt.s32.totalorder %s146_s12, %s146_s12 }
  0x29   :  { %175 = vmatprep.mubr.msk.f32.mxu0 %vm56_vm0, %v43_v5  ;;  %179 = vmatprep.subr.bf16.mxu0 %v178_v3  ;;  %v158_v8 = vld [vmem:[%s342_s2] ss:$0 sm:$0xff]  ;;  %p236_p2 = scmp.ne.s32.totalorder %s146_s12, %s235_s13  ;;  %p241_p4 = scmp.lt.s32.totalorder %s235_s13, %s235_s13 }
  0x2a   :  { %181 = vmatpush3.bf16.msra.mxu0 %v178_v3 }
  0x2b   :  { %183 = vmatprep.subr.bf16.mxu0 %v182_v6  ;;  %p242_p5 = por %p241_p4, %p240_p3 }
  0x2d   :  { %p243_p6 = pnand %p242_p5, %p236_p2 }
  0x2e   :  { %185 = vmatpush3.bf16.msra.mxu0 %v182_v6 }
  0x31   :  { %176 = vmatmul.mubr.msk.f32.vlgmr.msra.gmra.mrb[0].mxu0 %vm56_vm0, %v44_v7 }
 0x104   :  { %v177_v9 = vpop.f32.mrb[0].mxu0 }
 0x105   :  { %v135_v10 = vadd.f32 %v177_v9, %v158_v8  ;;  %v129_v11 = vpop.f32.mrb[1].mxu0 }
 0x106   :  { %v130_v12 = vadd.f32 %v158_v8, %v129_v11 }
 0x107   :  { %139 = vst.msk [vmem:[#allocation7 + $0x8] sm:$0xff] %vm56_vm0, %v135_v10 }
 0x108   :  { %138 = vst.msk [vmem:[#allocation7] sm:$0xff] %vm56_vm0, %v130_v12 }
 0x109   :  { %246 = shalt.err (!%p243_p6)
}
 0x10a   :  { %s247_s15 = scalar_lea.hbm %s343_s3, 256 }
 0x10b   :  { %p248_p7 = scmp.ne.s32.totalorder %s343_s3, %s247_s15  ;;  %p251_p8 = scmp.lt.u32.totalorder %s247_s15, %s343_s3 }
 0x10d   :  { %p253_p9 = pnand %p251_p8, %p248_p7 }
 0x10f   :  { %256 = shalt.err (!%p253_p9)
}
 0x110   :  { %151 = dma.vmem_to_hbm [thread:$0]  %s146_s12, 256, %s343_s3, [#allocation4], %s264_s22, %s264_s22, %s265_s23  }
 0x111   :  { %261 = dma.done.wait [#allocation4], 256  }
 0x112   :  { %262 = vsyncadd [#allocation4], 4294967040 }
 0x113   :  { %155 = vsyncpa [#allocation3], 1 }
 0x114   :  { %156 = vsyncpa [#allocation6], 1 }
 0x115   :  { %157 = vsyncpa [#allocation4], 1 }

</bundles_post_ra>
